<compile_context>
chip_gen: v7x
topology: tpu7x:2x2x1
jax: 0.10.0
libtpu: 0.0.40
codegen_flags: <defaults>
</compile_context>

<pallas_src>
import functools

import jax
import jax.numpy as jnp
from jax.experimental import pallas as pl
from jax.experimental.pallas import tpu as pltpu

_LANE = 128      # lane width (last-dim tiling unit)
_SUBLANE = 8     # sublane width (second-to-last-dim tiling unit)


def _round_up(n, m):
    return (n + m - 1) // m * m


# --------------------------------------------------------------------------
# Kernel
# --------------------------------------------------------------------------
def graph_agg_kernel(x_ref, w_ref, b_ref, o_ref, *, d_half):
    """One batch tile: transposed fused projection + gating + sublane reduce.

    x_ref: (TB, D_in)            w_ref: (2*d_half, D_in)
    b_ref: (2*d_half, 1) f32     o_ref: (1, 1, TB) f32 (lane-dense)
    """
    # (2*d_half, TB) = W_fused @ x^T, contracting D_in (MXU "NT" form, like
    # q @ k^T in flash attention); accumulate in f32.
    acc = jax.lax.dot_general(
        w_ref[...], x_ref[...],
        dimension_numbers=(((1,), (1,)), ((), ())),
        preferred_element_type=jnp.float32,
    )
    acc = acc + b_ref[...]                        # f32 bias, lane-broadcast

    # Activations only over the useful d_half sublane rows of each half.
    # Zero-pad invariant: padded sigmoid rows give sigmoid(0)=0.5 but are
    # multiplied by the matching padded tanh rows, tanh(0)=0 -> contribute 0.
    gate = jax.nn.sigmoid(acc[:d_half, :])        # (d_half, TB)
    val = jnp.tanh(acc[d_half:, :])               # (d_half, TB)

    total = jnp.sum(gate * val, axis=0, keepdims=True)   # (1, TB), XLU reduce
    o_ref[...] = total[None].astype(o_ref.dtype)          # (1, 1, TB), unmasked vst


# --------------------------------------------------------------------------
# One-time weight preparation (outside the hot path)
# --------------------------------------------------------------------------
def prepare_graph_agg_params(w_sig, b_sig, w_tanh, b_tanh, param_dtype=None):
    """Build the transposed fused weight [2*d_half, d_in].

    Sigmoid rows first, tanh rows second; d_out is zero-padded up to a
    multiple of 8 sublanes.  DO NOT reorder the halves, change an activation,
    or pad only one half: correctness of the padded rows relies on
    sigmoid(0) * tanh(0) == 0 (see kernel comment).

    Pass param_dtype=jnp.bfloat16 for the bf16 fast path (x is cast to match
    inside graph_aggregation); the bias is always kept in f32.
    """
    w_sig = jnp.asarray(w_sig)
    w_tanh = jnp.asarray(w_tanh)
    if param_dtype is None:
        param_dtype = w_sig.dtype
    d_out, d_in = w_sig.shape
    assert w_tanh.shape == (d_out, d_in), (w_tanh.shape, (d_out, d_in))
    d_half = _round_up(d_out, _SUBLANE)

    def pad_w(w):
        return jnp.pad(jnp.asarray(w, param_dtype), ((0, d_half - d_out), (0, 0)))

    def pad_b(b):
        return jnp.pad(jnp.asarray(b, jnp.float32), (0, d_half - d_out))

    w_cat = jnp.concatenate([pad_w(w_sig), pad_w(w_tanh)], axis=0)          # (2*d_half, d_in)
    b_cat = jnp.concatenate([pad_b(b_sig), pad_b(b_tanh)]).reshape(2 * d_half, 1)
    return {"w": w_cat, "b": b_cat, "d_out": d_out, "d_half": d_half}


# --------------------------------------------------------------------------
# pallas_call wrapper
# --------------------------------------------------------------------------
def _vmem_limit_bytes(needed):
    """Request enough scoped VMEM for the pipeline, with device-aware cap."""
    try:
        info = pltpu.get_tpu_info()
        capacity = int(getattr(info, "vmem_capacity_bytes", 64 << 20))
    except Exception:  # capability query only; conservative (v7x per-TC) fallback
        capacity = 64 << 20
    cap = max(32 << 20, capacity - (16 << 20))   # headroom for Mosaic scratch
    want = 2 * needed + (4 << 20)
    return int(min(cap, max(want, 16 << 20)))


def _choose_tb(B, d_in, d_half, x_itemsize):
    """Pick the batch tile: lane multiple (lane-dense output), ~4 MiB of x."""
    tb = (4 << 20) // max(1, d_in * x_itemsize)               # ~4 MiB of x per tile
    tb = min(tb, (8 << 20) // max(1, 2 * d_half * 4))          # bound f32 intermediates
    tb = max(min(tb, 8192), 512)
    tb = min(tb, _round_up(B, _LANE))                          # don't exceed padded batch
    if B > _LANE:                                              # >=2 grid steps (v7x: 2 TCs)
        tb = min(tb, _round_up((B + 1) // 2, _LANE))
    return _round_up(tb, _LANE)                                # 128 covers all sublane needs


def _pallas_graph_agg(x, w_cat, b_cat, *, tb, d_half):
    b_pad, d_in = x.shape
    num_tiles = b_pad // tb
    d2 = 2 * d_half
    x_item = jnp.dtype(x.dtype).itemsize
    w_item = jnp.dtype(w_cat.dtype).itemsize
    d_in_vmem = _round_up(d_in, _LANE)                         # lane-padded VMEM width

    needed = (2 * tb * d_in_vmem * x_item                      # double-buffered x tiles
              + 2 * d2 * d_in_vmem * w_item                    # fused W (tiny, resident)
              + 2 * d2 * _LANE * 4                             # bias
              + 2 * _SUBLANE * tb * 4                          # double-buffered out tiles
              + 3 * d2 * tb * 4)                               # f32 acc/gate/val temps

    cost = pl.CostEstimate(
        flops=2 * b_pad * d_in * d2,
        transcendentals=b_pad * d2,
        bytes_accessed=b_pad * d_in * x_item + d2 * d_in * w_item + b_pad * 4,
    )

    return pl.pallas_call(
        functools.partial(graph_agg_kernel, d_half=d_half),
        out_shape=jax.ShapeDtypeStruct((num_tiles, 1, tb), jnp.float32),
        grid=(num_tiles,),
        in_specs=[
            pl.BlockSpec((tb, d_in), lambda i: (i, 0)),        # x tile (pipelined)
            pl.BlockSpec((d2, d_in), lambda i: (0, 0)),        # fused W (constant block)
            pl.BlockSpec((d2, 1), lambda i: (0, 0)),           # fused bias (f32)
        ],
        out_specs=pl.BlockSpec((1, 1, tb), lambda i: (i, 0, 0)),  # lane-dense output
        compiler_params=pltpu.CompilerParams(
            dimension_semantics=("parallel",),                 # batch tiles independent
            vmem_limit_bytes=_vmem_limit_bytes(needed),
        ),
        cost_estimate=cost,
    )(x, w_cat, b_cat)


def graph_aggregation(x, params, *, tb=None):
    """Hot-path forward. x: [B, D_in]. Returns [B, 1] in f32."""
    x = jnp.asarray(x)
    B, d_in = x.shape
    w_cat, b_cat, d_half = params["w"], params["b"], params["d_half"]
    assert w_cat.shape == (2 * d_half, d_in), (w_cat.shape, d_in, d_half)

    if x.dtype != w_cat.dtype:
        # Keep both matmul operands in one dtype (bf16 fast path / f32 path).
        x = x.astype(w_cat.dtype)

    if tb is None:
        tb = _choose_tb(B, d_in, d_half, jnp.dtype(x.dtype).itemsize)
    else:
        tb = _round_up(tb, _LANE)                              # lane-dense output needs 128|tb

    b_pad = _round_up(B, tb)
    x_p = x if b_pad == B else jnp.pad(x, ((0, b_pad - B), (0, 0)))

    out = _pallas_graph_agg(x_p, w_cat, b_cat, tb=tb, d_half=d_half)  # (b_pad//tb, 1, tb)
    out = out.reshape(b_pad, 1)
    return out if b_pad == B else out[:B]


# --------------------------------------------------------------------------
# Pure-JAX reference (replicates the PyTorch forward exactly)
# --------------------------------------------------------------------------
def graph_aggregation_ref(x, w_sig, b_sig, w_tanh, b_tanh):
    xf = jnp.asarray(x, jnp.float32)
    i = jax.nn.sigmoid(xf @ jnp.asarray(w_sig, jnp.float32).T + b_sig)
    j = jnp.tanh(xf @ jnp.asarray(w_tanh, jnp.float32).T + b_tanh)
    return jnp.sum(i * j, axis=1).reshape(-1, 1)


if __name__ == "__main__":
    B, D_in, D_out = 300, 32, 16

    key = jax.random.PRNGKey(0)
    kx, kws, kbs, kwt, kbt = jax.random.split(key, 5)

    # Deterministic init mimicking nn.Linear's U(-1/sqrt(in), 1/sqrt(in)).
    bound = 1.0 / (D_in ** 0.5)
    x = jax.random.normal(kx, (B, D_in), dtype=jnp.float32)
    w_sig = jax.random.uniform(kws, (D_out, D_in), jnp.float32, -bound, bound)
    b_sig = jax.random.uniform(kbs, (D_out,), jnp.float32, -bound, bound)
    w_tanh = jax.random.uniform(kwt, (D_out, D_in), jnp.float32, -bound, bound)
    b_tanh = jax.random.uniform(kbt, (D_out,), jnp.float32, -bound, bound)

    ref = graph_aggregation_ref(x, w_sig, b_sig, w_tanh, b_tanh)

    # f32 path, explicit tb=128 to exercise a multi-step batch grid (grid=(3,)).
    params_f32 = prepare_graph_agg_params(w_sig, b_sig, w_tanh, b_tanh)
    out = jax.block_until_ready(graph_aggregation(x, params_f32, tb=128))
    assert out.shape == (B, 1), out.shape
    assert jnp.allclose(out, ref, atol=1e-4, rtol=1e-4), (out, ref)

    # f32 path with automatic d_in-aware tile selection (grid=(2,) here).
    out_auto = jax.block_until_ready(graph_aggregation(x, params_f32))
    assert jnp.allclose(out_auto, ref, atol=1e-4, rtol=1e-4)

    # bf16 fast path (bf16 x + bf16 fused W, f32 accumulation/output);
    # looser tolerance vs. the f32 reference.
    params_bf16 = prepare_graph_agg_params(
        w_sig, b_sig, w_tanh, b_tanh, param_dtype=jnp.bfloat16)
    out_bf16 = jax.block_until_ready(
        graph_aggregation(x.astype(jnp.bfloat16), params_bf16))
    assert out_bf16.dtype == jnp.float32
    assert jnp.allclose(out_bf16, ref, atol=5e-2, rtol=5e-2)

    print("KERNEL_OK")
</pallas_src>

<mosaic_0001>
module attributes {stable_mosaic.version = 11 : i64} {
  func.func @graph_agg_kernel(%arg0: i32, %arg1: memref<128x32xf32, #tpu.memory_space<vmem>>, %arg2: memref<32x32xf32, #tpu.memory_space<vmem>>, %arg3: memref<32x1xf32, #tpu.memory_space<vmem>>, %arg4: memref<1x1x128xf32, #tpu.memory_space<vmem>>) attributes {dimension_semantics = [#tpu.dimension_semantics<parallel>], iteration_bounds = array<i64: 3>, scalar_prefetch = 0 : i64, scratch_operands = 0 : i64, tpu.core_type = #tpu.core_type<tc>, window_params = [{transform_indices = @transform_0, window_bounds = array<i64: 128, 32>}, {pipeline_mode = #tpu.pipeline_mode<synchronous>, transform_indices = @transform_1, window_bounds = array<i64: 32, 32>}, {pipeline_mode = #tpu.pipeline_mode<synchronous>, transform_indices = @transform_2, window_bounds = array<i64: 32, 1>}, {transform_indices = @transform_3, window_bounds = array<i64: 1, 1, 128>}]} {
    %c0 = arith.constant 0 : index
    %c0_0 = arith.constant 0 : index
    %0 = vector.load %arg2[%c0, %c0_0] : memref<32x32xf32, #tpu.memory_space<vmem>>, vector<32x32xf32>
    %c0_1 = arith.constant 0 : index
    %c0_2 = arith.constant 0 : index
    %1 = vector.load %arg1[%c0_1, %c0_2] : memref<128x32xf32, #tpu.memory_space<vmem>>, vector<128x32xf32>
    %cst = arith.constant dense<0.000000e+00> : vector<32x128xf32>
    %2 = tpu.matmul %0, %1, %cst {dimension_numbers = #tpu.dot_dimension_numbers<[1], [1], [0], [0], [0, 0, 1, 0], [], []>} : vector<32x32xf32>, vector<128x32xf32>, vector<32x128xf32> -> vector<32x128xf32>
    %c0_3 = arith.constant 0 : index
    %c0_4 = arith.constant 0 : index
    %3 = vector.load %arg3[%c0_3, %c0_4] : memref<32x1xf32, #tpu.memory_space<vmem>>, vector<32x1xf32>
    %4 = vector.broadcast %3 : vector<32x1xf32> to vector<32x128xf32>
    %5 = arith.addf %2, %4 : vector<32x128xf32>
    %6 = vector.extract_strided_slice %5 {offsets = [0, 0], sizes = [16, 128], strides = [1, 1]} : vector<32x128xf32> to vector<16x128xf32>
    %7 = arith.negf %6 : vector<16x128xf32>
    %8 = math.exp %7 : vector<16x128xf32>
    %cst_5 = arith.constant 1.000000e+00 : f32
    %9 = vector.broadcast %cst_5 : f32 to vector<16x128xf32>
    %10 = arith.addf %9, %8 : vector<16x128xf32>
    %11 = arith.divf %9, %10 : vector<16x128xf32>
    %12 = vector.extract_strided_slice %5 {offsets = [16, 0], sizes = [16, 128], strides = [1, 1]} : vector<32x128xf32> to vector<16x128xf32>
    %13 = math.tanh %12 : vector<16x128xf32>
    %14 = arith.mulf %11, %13 : vector<16x128xf32>
    %cst_6 = arith.constant dense<0.000000e+00> : vector<128xf32>
    %15 = vector.multi_reduction <add>, %14, %cst_6 [0] : vector<16x128xf32> to vector<128xf32>
    %16 = vector.shape_cast %15 : vector<128xf32> to vector<1x128xf32>
    %17 = vector.shape_cast %16 : vector<1x128xf32> to vector<1x1x128xf32>
    %c0_7 = arith.constant 0 : index
    %c0_8 = arith.constant 0 : index
    %c0_9 = arith.constant 0 : index
    %18 = vector.load %arg4[%c0_7, %c0_8, %c0_9] : memref<1x1x128xf32, #tpu.memory_space<vmem>>, vector<1x1x128xf32>
    tpu.vector_store %arg4[%c0_7, %c0_8, %c0_9], %17 {strides = array<i32>} : memref<1x1x128xf32, #tpu.memory_space<vmem>>, vector<1x1x128xf32>,
    return
  }
  func.func @transform_0(%arg0: i32) -> (i32, i32) {
    %c0_i32 = arith.constant 0 : i32
    %c0_i32_0 = arith.constant 0 : i32
    return %arg0, %c0_i32 : i32, i32
  }
  func.func @transform_1(%arg0: i32) -> (i32, i32) {
    %c0_i32 = arith.constant 0 : i32
    %c0_i32_0 = arith.constant 0 : i32
    %c0_i32_1 = arith.constant 0 : i32
    return %c0_i32, %c0_i32_0 : i32, i32
  }
  func.func @transform_2(%arg0: i32) -> (i32, i32) {
    %c0_i32 = arith.constant 0 : i32
    %c0_i32_0 = arith.constant 0 : i32
    %c0_i32_1 = arith.constant 0 : i32
    return %c0_i32, %c0_i32_0 : i32, i32
  }
  func.func @transform_3(%arg0: i32) -> (i32, i32, i32) {
    %c0_i32 = arith.constant 0 : i32
    %c0_i32_0 = arith.constant 0 : i32
    %c0_i32_1 = arith.constant 0 : i32
    return %arg0, %c0_i32, %c0_i32_0 : i32, i32, i32
  }
}

</mosaic_0001>

<bundles_post_ra>
// kernel: tpu_custom_call.1
= control target key start
LH: loop header
LB: loop body
LE: loop exit
PB: predicated region body
PF: predicated region fallthrough
CT: control target
= control target key end

     0   :  { %8 = vsyncpa [#allocation3], 0  ;;  %s960_s0 = inlined_call_operand.vmem [shape: f32[384,32], index: 0, kind: input, shape index: {}]   ;;  %s961_s1 = inlined_call_operand.vmem [shape: f32[32,32], index: 1, kind: input, shape index: {}]   ;;  %s962_s2 = inlined_call_operand.vmem [shape: f32[32,1], index: 2, kind: input, shape index: {}]   ;;  %s963_s3 = inlined_call_operand.hbm [shape: f32[3,1,128], index: 3, kind: output, shape index: {}]  }
   0x1   :  { %10 = vsyncpa [#allocation3 + $0x1], 0  ;;  %s745_s12 = smov 0   ;;  %s747_s13 = smov 0  }
   0x2   :  { %s749_s14 = smov 0   ;;  %s751_s15 = smov 0  }
   0x3 LB: > { %s451_s16 = sadd.s32 4294967295, %s721_s15   ;;  %s452_s17 = sadd.s32 4294967294, %s721_s15   ;;  %s721_s15 = sphi %s751_s15, %s971_s15   ;;  %s717_s14 = sphi %s749_s14, %s970_s14   ;;  %s713_s13 = sphi %s747_s13, %s969_s13   ;;  %s709_s12 = sphi %s745_s12, %s968_s12  }
   0x4   : > { %s768_s18 = sadd.s32 1, %s721_s15   ;;  %s91_s19 = sadd.s32 1, %s717_s14 }
   0x5   : > { %s88_s20 = ssub.s32 %s721_s15, %s768_s18  ;;  %p101_p0 = scmp.ne.s32.totalorder %s717_s14, %s713_s13 }
   0x6   : > { %p89_p1 = scmp.eq.s32.totalorder %s88_s20, 0  ;;  %p102_p2 = scmp.eq.s32.totalorder %s451_s16, 2 }
   0x7   : > { %p107_p3 = scmp.ne.s32.totalorder %s713_s13, %s709_s12  ;;  %p108_p4 = scmp.eq.s32.totalorder %s452_s17, 2 }
   0x8   : > { %s778_s21 = scalar_select %p89_p1, %s717_s14, %s91_s19  }
   0x9   : > { %p780_p5 = por %p102_p2, %p101_p0  ;;  %p784_p6 = por %p108_p4, %p107_p3 }
   0xa   : > { %p455_p7 = scmp.ge.s32.totalorder %s721_s15, 1  ;;  %p141_p8 = scmp.lt.s32.totalorder %s721_s15, 4 }
   0xc   : > { %p142_p9 = pnand %p455_p7, %p141_p8 }
   0xd   : > { %s790_s24 = sshll.u32 (!%p142_p9), %s451_s16, 4  ;;  %vm214_vm0 = vcmask (!%p142_p9), 261120   ;;  %v170_v0 = vld [vmem:[%s961_s1] sm:$0xff] (!%p142_p9)  ;;  %v172_v1 = vld [vmem:[%s961_s1 + $0x10] sm:$0xff] (!%p142_p9)  ;;  %v723_v3 = vmov (!%p142_p9), 0   ;;  %v191_v5 = vld [vmem:[%s962_s2 + $0x8] sm:$0xff] (!%p142_p9) }
   0xe   : > { %145 = sbr.rel (%p142_p9) target bundleno = 363 (0x16b), region = 32  ;;  %p165_p10 = scmp.lt.s32.totalorder (!%p142_p9), %s790_s24, 47  ;;  %535 = vmatprep.mubr.msk.f32.mxu0 (!%p142_p9), %vm214_vm0, %v170_v0  ;;  %538 = vmatprep.mubr.msk.f32.mxu1 (!%p142_p9), %vm214_vm0, %v172_v1  ;;  %v190_v2 = vld [vmem:[%s962_s2] sm:$0xff] (!%p142_p9)  ;;  %v192_v4 = vld [vmem:[%s962_s2 + $0x10] sm:$0xff] (!%p142_p9)  ;;  %v193_v6 = vld [vmem:[%s962_s2 + $0x18] sm:$0xff] (!%p142_p9) }
   0xf   : > { %645 = vset.pattern.permute.xlu0 (!%p142_p9), %v723_v3  ;;  %646 = vset.pattern.permute.xlu1 (!%p142_p9), %v723_v3  ;;  %vm821_vm1 = vmpackc.low (!%p142_p9), %vm214_vm0, %vm214_vm0  ;;  %v171_v32 = vld [vmem:[%s961_s1 + $0x8] sm:$0xff] (!%p142_p9)  ;;  %v173_v33 = vld [vmem:[%s961_s1 + $0x18] sm:$0xff] (!%p142_p9)  ;;  %s162_s28 = sand.u32 (!%p142_p9), 1, %s713_s13   ;;  %s724_s9 = smov (!%p142_p9), [#allocation2]  }
  0x10   : > { %196 = vperm.xlu0 (!%p142_p9), %645, %v190_v2   ;;  %206 = vperm.xlu1 (!%p142_p9), %646, %v192_v4   ;;  %s163_s29 = scalar_lea.vmem (!%p142_p9), [#allocation2], %s162_s28  ;;  %s385_s7 = scalar_lea.sflag (!%p142_p9), [#allocation3], %s162_s28 }
  0x11   : > { %s397_s30 = sshll.u32 (!%p142_p9), %s163_s29, 4  ;;  %s663_s10 = sshll.u32 (!%p142_p9), %s724_s9, 4  ;;  %s920_s30 = int_to_ptr.vmem [resolvable:$true] %s397_s30  ;;  %s664_s10 = int_to_ptr.vmem [resolvable:$false] %s663_s10 }
  0x12   : > { %s659_s8 = scalar_lea.vmem (!%p142_p9), %s920_s30, 16  ;;  %p666_p0 = scmp.lt.s32.totalorder (!%p142_p9), %s920_s30, %s664_s10 }
  0x13   : > { %p660_p11 = scmp.ne.s32.totalorder (!%p142_p9), %s920_s30, %s659_s8 }
  0x14   : > { %201 = vperm.xlu0 (!%p142_p9), %645, %v191_v5   ;;  %211 = vperm.xlu1 (!%p142_p9), %646, %v193_v6  }
  0x15   : > { %s166_s6 = scalar_select %p165_p10, %s790_s24, 47 }
  0x16   : > { %p661_p12 = pnand %p660_p11, %p780_p5 }
  0x17   : > { %s457_s11 = sshll.u32 %s166_s6, 3  ;;  %s918_s6 = scalar_lea.hbm %s963_s3, %s790_s24 }
  0x18   : > { %s817_s19 = scalar_lea.vmem %s960_s0, %s457_s11  ;;  %p662_p13 = pneg %p661_p12 }
  0x19   : > { %v174_v8 = vld [vmem:[%s817_s19] sm:$0xff]  ;;  %v175_v9 = vld [vmem:[%s817_s19 + $0x8] sm:$0xff]  ;;  %v176_v10 = vld [vmem:[%s817_s19 + $0x10] sm:$0xff]  ;;  %s665_s11 = scalar_lea.vmem %s664_s10, 32 }
  0x1a   : > { %v541_v11 = vpack.c.bf16 %v175_v9, %v174_v8  ;;  %v177_v12 = vld [vmem:[%s817_s19 + $0x18] sm:$0xff]  ;;  %v178_v14 = vld [vmem:[%s817_s19 + $0x20] sm:$0xff]  ;;  %v179_v15 = vld [vmem:[%s817_s19 + $0x28] sm:$0xff]  ;;  %p667_p1 = scmp.lt.s32.totalorder %s665_s11, %s659_s8 }
  0x1b   : > { %v547_v13 = vpack.c.bf16 %v177_v12, %v176_v10  ;;  %v553_v16 = vpack.c.bf16 %v179_v15, %v178_v14  ;;  %v180_v17 = vld [vmem:[%s817_s19 + $0x30] sm:$0xff]  ;;  %v181_v18 = vld [vmem:[%s817_s19 + $0x38] sm:$0xff]  ;;  %v182_v20 = vld [vmem:[%s817_s19 + $0x40] sm:$0xff] }
  0x1c   : > { %543 = vmatprep.subr.msk.bf16.mxu0 %vm821_vm1, %v541_v11  ;;  %589 = vmatprep.subr.msk.bf16.mxu1 %vm821_vm1, %v541_v11  ;;  %v559_v19 = vpack.c.bf16 %v181_v18, %v180_v17  ;;  %v183_v21 = vld [vmem:[%s817_s19 + $0x48] sm:$0xff]  ;;  %v184_v23 = vld [vmem:[%s817_s19 + $0x50] sm:$0xff]  ;;  %v185_v24 = vld [vmem:[%s817_s19 + $0x58] sm:$0xff]  ;;  %p668_p2 = por %p667_p1, %p666_p0 }
  0x1d   : > { %546 = vmatpush3.bf16.xpose.msk.msra.mxu0 %vm821_vm1, %v541_v11  ;;  %597 = vmatpush3.bf16.xpose.msk.msra.mxu1 %vm821_vm1, %v541_v11  ;;  %v565_v22 = vpack.c.bf16 %v183_v21, %v182_v20  ;;  %v571_v25 = vpack.c.bf16 %v185_v24, %v184_v23  ;;  %v186_v26 = vld [vmem:[%s817_s19 + $0x60] sm:$0xff]  ;;  %v187_v27 = vld [vmem:[%s817_s19 + $0x68] sm:$0xff]  ;;  %v188_v29 = vld [vmem:[%s817_s19 + $0x70] sm:$0xff] }
  0x1e   : > { %549 = vmatprep.subr.msk.bf16.mxu0 %vm821_vm1, %v547_v13  ;;  %590 = vmatprep.subr.msk.bf16.mxu1 %vm821_vm1, %v547_v13  ;;  %v577_v28 = vpack.c.bf16 %v187_v27, %v186_v26  ;;  %v189_v30 = vld [vmem:[%s817_s19 + $0x78] sm:$0xff]  ;;  %p669_p3 = pnand %p668_p2, %p662_p13 }
  0x1f   : > { %v583_v31 = vpack.c.bf16 %v189_v30, %v188_v29 }
  0x25   : > { %552 = vmatpush3.bf16.xpose.msk.msra.mxu0 %vm821_vm1, %v547_v13  ;;  %598 = vmatpush3.bf16.xpose.msk.msra.mxu1 %vm821_vm1, %v547_v13 }
  0x26   : > { %555 = vmatprep.subr.msk.bf16.mxu0 %vm821_vm1, %v553_v16  ;;  %591 = vmatprep.subr.msk.bf16.mxu1 %vm821_vm1, %v553_v16 }
  0x2d   : > { %558 = vmatpush3.bf16.xpose.msk.msra.mxu0 %vm821_vm1, %v553_v16  ;;  %599 = vmatpush3.bf16.xpose.msk.msra.mxu1 %vm821_vm1, %v553_v16 }
  0x2e   : > { %561 = vmatprep.subr.msk.bf16.mxu0 %vm821_vm1, %v559_v19  ;;  %592 = vmatprep.subr.msk.bf16.mxu1 %vm821_vm1, %v559_v19 }
  0x35   : > { %564 = vmatpush3.bf16.xpose.msk.msra.mxu0 %vm821_vm1, %v559_v19  ;;  %600 = vmatpush3.bf16.xpose.msk.msra.mxu1 %vm821_vm1, %v559_v19 }
  0x36   : > { %567 = vmatprep.subr.msk.bf16.mxu0 %vm821_vm1, %v565_v22  ;;  %593 = vmatprep.subr.msk.bf16.mxu1 %vm821_vm1, %v565_v22 }
  0x3d   : > { %570 = vmatpush3.bf16.xpose.msk.msra.mxu0 %vm821_vm1, %v565_v22  ;;  %601 = vmatpush3.bf16.xpose.msk.msra.mxu1 %vm821_vm1, %v565_v22 }
  0x3e   : > { %573 = vmatprep.subr.msk.bf16.mxu0 %vm821_vm1, %v571_v25  ;;  %594 = vmatprep.subr.msk.bf16.mxu1 %vm821_vm1, %v571_v25 }
  0x45   : > { %576 = vmatpush3.bf16.xpose.msk.msra.mxu0 %vm821_vm1, %v571_v25  ;;  %602 = vmatpush3.bf16.xpose.msk.msra.mxu1 %vm821_vm1, %v571_v25 }
  0x46   : > { %579 = vmatprep.subr.msk.bf16.mxu0 %vm821_vm1, %v577_v28  ;;  %595 = vmatprep.subr.msk.bf16.mxu1 %vm821_vm1, %v577_v28 }
  0x4d   : > { %582 = vmatpush3.bf16.xpose.msk.msra.mxu0 %vm821_vm1, %v577_v28  ;;  %603 = vmatpush3.bf16.xpose.msk.msra.mxu1 %vm821_vm1, %v577_v28 }
  0x4e   : > { %585 = vmatprep.subr.msk.bf16.mxu0 %vm821_vm1, %v583_v31  ;;  %596 = vmatprep.subr.msk.bf16.mxu1 %vm821_vm1, %v583_v31 }
  0x55   : > { %588 = vmatpush3.bf16.xpose.msk.msra.mxu0 %vm821_vm1, %v583_v31  ;;  %604 = vmatpush3.bf16.xpose.msk.msra.mxu1 %vm821_vm1, %v583_v31 }
  0x5c   : > { %536 = vmatmul.mubr.msk.f32.vlgmr.msra.gmra.mrb[0].mxu0 %vm214_vm0, %v171_v32  ;;  %539 = vmatmul.mubr.msk.f32.vlgmr.msra.gmra.mrb[0].mxu1 %vm214_vm0, %v173_v33 }
  0x8f   : > { %v197_v34 = vpop.permute.xlu0 %196  ;;  %v207_v43 = vpop.permute.xlu1 %206 }
  0x93   : > { %v202_v35 = vpop.permute.xlu0 %201  ;;  %v212_v45 = vpop.permute.xlu1 %211 }
 0x12f   : > { %v537_v36 = vpop.f32.mrb[0].mxu0  ;;  %v540_v37 = vpop.f32.mrb[0].mxu1 }
 0x130   : > { %v347_v38 = vadd.f32 %v537_v36, %v202_v35  ;;  %v341_v39 = vpop.f32.mrb[1].mxu0  ;;  %v351_v40 = vpop.f32.mrb[1].mxu1  ;;  %v357_v46 = vadd.f32 %v540_v37, %v212_v45 }
 0x131   : > { %v342_v41 = vadd.f32 %v341_v39, %v197_v34  ;;  %v352_v47 = vadd.f32 %v351_v40, %v207_v43 }
 0x132   : > { %v479_v42 = vmul.f32 -1.442695, %v347_v38 }
 0x133   : > { %v478_v44 = vmul.f32 -1.442695, %v342_v41 }
 0x134   : > { %647 = vpow2.f32 %v479_v42 }
 0x135   : > { %649 = vpow2.f32 %v478_v44 }
 0x136   : > { %651 = vtanh.f32 %v357_v46 }
 0x137   : > { %653 = vtanh.f32 %v352_v47 }
 0x13e   : > { %v648_v48 = vpop.eup %647 }
 0x13f   : > { %v650_v49 = vpop.eup %649  ;;  %v367_v50 = vadd.f32 1.0, %v648_v48 }
 0x140   : > { %v366_v51 = vadd.f32 1.0, %v650_v49  ;;  %v652_v52 = vpop.eup %651 }
 0x141   : > { %655 = vrcp.f32 %v367_v50  ;;  %v654_v53 = vpop.eup %653 }
 0x142   : > { %657 = vrcp.f32 %v366_v51 }
 0x14b   : > { %v656_v54 = vpop.eup %655 }
 0x14c   : > { %v658_v55 = vpop.eup %657  ;;  %v375_v56 = vmul.f32 %v656_v54, %v652_v52 }
 0x14d   : > { %v374_v57 = vmul.f32 %v658_v55, %v654_v53 }
 0x14f   : > { %v376_v58 = vadd.f32 %v375_v56, %v374_v57 }
 0x151   : > { %v377_v59 = vrot.slane %v376_v58, 4 }
 0x153   : > { %v378_v60 = vadd.f32 %v377_v59, %v376_v58 }
 0x155   : > { %v379_v61 = vrot.slane %v378_v60, 2 }
 0x157   : > { %v380_v62 = vadd.f32 %v379_v61, %v378_v60 }
 0x159   : > { %v381_v63 = vrot.slane %v380_v62, 1 }
 0x15b   : > { %v382_v0 = vadd.f32 %v381_v63, %v380_v62 }
 0x15d   : > { %383 = vst [vmem:[%s163_s29] sm:$0x1] %v382_v0 }
 0x15e   : > { %672 = shalt.err (!%p669_p3)
}
 0x15f   : > { %s673_s24 = scalar_lea.hbm %s918_s6, 16  ;;  %s677_s19 = scalar_lea.hbm %s963_s3, 48 }
 0x160   : > { %p674_p4 = scmp.ne.s32.totalorder %s918_s6, %s673_s24  ;;  %p678_p9 = scmp.lt.u32.totalorder %s918_s6, %s963_s3 }
 0x161   : > { %p679_p10 = scmp.lt.u32.totalorder %s677_s19, %s673_s24  ;;  %p681_p12 = scmp.lt.u32.totalorder %s673_s24, %s918_s6 }
 0x162   : > { %p675_p7 = pnand %p674_p4, %p780_p5 }
 0x163   : > { %p680_p11 = por %p679_p10, %p678_p9 }
 0x164   : > { %p676_p8 = pneg %p675_p7 }
 0x165   : > { %p682_p13 = por %p681_p12, %p680_p11 }
 0x167   : > { %p683_p0 = pnand %p682_p13, %p676_p8 }
 0x169   : > { %686 = shalt.err (!%p683_p0)
}
 0x16a   : > { %605 = dma.vmem_to_hbm [thread:$0]  (%p780_p5), %s920_s30, 16, %s918_s6, %s385_s7  }
 0x16b PF: > { %p611_p1 = scmp.ge.s32.totalorder %s721_s15, 2  ;;  %s409_s26 = sand.u32 1, %s709_s12  }
 0x16c   : > { %s410_s27 = scalar_lea.sflag [#allocation3], %s409_s26 }
 0x16d   : > { %p608_p2 = pnand %p611_p1, %p784_p6 }
 0x16f   : > { %704 = dma.done.wait (!%p608_p2), %s410_s27, 16  }
 0x170   : > { %706 = vsyncadd (!%p608_p2), %s410_s27, 4294967280  ;;  %p13_p3 = scmp.ge.s32.totalorder %s768_s18, 5   ;;  %s968_s12 = smov %s713_s13 }
 0x171   : > { %s969_s13 = smov %s717_s14  ;;  %s970_s14 = smov %s778_s21 }
 0x172   : > { %s971_s15 = smov %s768_s18  ;;  %15 = sbr.rel (!%p13_p3) target bundleno = 3 (0x3), region = 67 }
 0x179   :  { %414 = vsyncpa [#allocation3], 1 }
 0x17a   :  { %416 = vsyncpa [#allocation3 + $0x1], 1 }

</bundles_post_ra>
